<compile_context>
chip_gen: v6e
topology: v6e:2x2x1
jax: 0.10.0
libtpu: 0.0.40
codegen_flags: <defaults>
</compile_context>

<pallas_src>
import functools

import jax
import jax.numpy as jnp
from jax.experimental import pallas as pl
from jax.experimental.pallas import tpu as pltpu


MAX_TILE = 2048          # pixels per grid step (lane axis); multiple of 128


# ------------------------------ Pallas kernels -------------------------------

def _wxb_kernel(x_ref, w_ref, b_ref, o_ref):
    # o[Cout, T] = W[Cout, Cin] @ x[Cin, T] + b[Cout, 1]
    o_ref[0] = (jnp.dot(w_ref[...], x_ref[0],
                        preferred_element_type=jnp.float32) + b_ref[...])


def _add_wxb_kernel(x_ref, s_ref, w_ref, b_ref, o_ref):
    # Fused skip-add + pointwise conv: o = W @ (x + skip) + b
    o_ref[0] = (jnp.dot(w_ref[...], x_ref[0] + s_ref[0],
                        preferred_element_type=jnp.float32) + b_ref[...])


# ------------------------------ Pallas wrappers -------------------------------

def _pointwise_call(kernel, xs, w, b):
    """o = W @ (elementwise-sum of xs) + b per pixel.  xs: list of (B,Cin,N)."""
    B, Cin, N = xs[0].shape
    Cout = w.shape[0]
    T = N if N <= MAX_TILE else MAX_TILE          # full dim or 128-multiple
    grid = (B, pl.cdiv(N, T))
    act_spec = pl.BlockSpec((1, Cin, T), lambda bb, tt: (bb, 0, tt))
    return pl.pallas_call(
        kernel,
        out_shape=jax.ShapeDtypeStruct((B, Cout, N), jnp.float32),
        grid=grid,
        in_specs=[act_spec] * len(xs) + [
            pl.BlockSpec((Cout, Cin), lambda bb, tt: (0, 0)),   # resident weight
            pl.BlockSpec((Cout, 1), lambda bb, tt: (0, 0)),     # resident bias
        ],
        out_specs=pl.BlockSpec((1, Cout, T), lambda bb, tt: (bb, 0, tt)),
        compiler_params=pltpu.CompilerParams(
            dimension_semantics=("parallel", "parallel")),
    )(*xs, w, b.reshape(Cout, 1))


def conv1x1(x, w, b):
    return _pointwise_call(_wxb_kernel, [x], w, b)


def add_conv1x1(x, skip, w, b):
    return _pointwise_call(_add_wxb_kernel, [x, skip], w, b)


# ---------------------- Downsample / Upsample (NCHW glue) --------------------
# Exact ports of the einops chains in the reference (pure reshape/transpose).

def downsample(x, d):
    B, C, H, W = x.shape
    d2 = d * d
    hd, wd = H // d2, W // d2
    x = x.reshape(B, C, hd, d2, wd, d2)
    x = x.transpose(0, 1, 2, 4, 3, 5).reshape(B, C * hd * wd, d2, d2)
    x = x.reshape(B, C * hd * wd, d, d, d, d)
    x = x.transpose(0, 1, 2, 4, 3, 5).reshape(B, C * hd * wd, d2, d, d)
    x = x.reshape(B, C, hd, wd, d2, d, d)
    x = x.transpose(0, 1, 4, 2, 5, 3, 6).reshape(B, C * d2, hd * d, wd * d)
    return x


def upsample(x, d):
    B, C, H, W = x.shape
    d2 = d * d
    c = C // d2
    hd, wd = H // d, W // d
    x = x.reshape(B, c, d2, hd, d, wd, d)
    x = x.transpose(0, 1, 3, 5, 2, 4, 6).reshape(B, c * hd * wd, d2, d, d)
    x = x.reshape(B, c * hd * wd, d, d, d, d)
    x = x.transpose(0, 1, 2, 4, 3, 5).reshape(B, c * hd * wd, d2, d2)
    x = x.reshape(B, c, hd, wd, d2, d2)
    x = x.transpose(0, 1, 2, 4, 3, 5).reshape(B, c, hd * d2, wd * d2)
    return x


# -------------------------------- parameters ---------------------------------

def _compose(*layers):
    # layers applied in order; returns (W, b) with y = W x + b  (channels-first)
    wc, bc = layers[0]
    for w, b in layers[1:]:
        wc, bc = w @ wc, w @ bc + b
    return wc, bc


def init_params(key, img_channel, dilation, width):
    def conv(k, cout, cin):
        k1, k2 = jax.random.split(k)
        w = jax.random.normal(k1, (cout, cin), jnp.float32) * 0.1
        b = jax.random.normal(k2, (cout,), jnp.float32) * 0.1
        return w, b

    K = 2 * dilation - 1
    c = K // 2
    keys = jax.random.split(key, 12)
    intro = conv(keys[0], width, img_channel)
    wk = jax.random.normal(keys[1], (K, K, width, width), jnp.float32) * 0.1
    wk = wk.at[c, c].set(0.0)            # CentralMaskedConv2d center tap == 0
    bk = jax.random.normal(keys[2], (width,), jnp.float32) * 0.1
    mc1 = conv(keys[3], width, width)
    mc2 = conv(keys[4], width, width)
    down0 = conv(keys[5], width // 2, width)
    up0 = conv(keys[6], width * 4, width * 2)
    final = conv(keys[7], width, width)
    tail0 = conv(keys[8], width, width)
    tail1 = conv(keys[9], width // 2, width)
    tail2 = conv(keys[10], width // 2, width // 2)
    tail3 = conv(keys[11], img_channel, width // 2)

    # ---- offline composition (network is entirely linear in this config) ----
    w_in_aug = jnp.concatenate([intro[0], intro[1][:, None]], axis=1)  # (w, img+1)
    w12, b12 = _compose(mc1, mc2)
    blocks = []
    for kh in range(K):
        for kw in range(K):
            if kh == c and kw == c:
                continue
            blocks.append(w12 @ wk[kh, kw] @ w_in_aug)     # (width, img+1)
    fused_mc = (jnp.concatenate(blocks, axis=1), w12 @ bk + b12)
    fused_tail = _compose(final, tail0, tail1, tail2, tail3)   # (img, width)

    fused = {'fused_mc': fused_mc, 'down0': down0, 'up0': up0,
             'fused_tail': fused_tail}
    raw = {'intro': intro, 'mc0': (wk, bk), 'mc1': mc1, 'mc2': mc2,
           'down0': down0, 'up0': up0, 'final': final,
           'tail0': tail0, 'tail1': tail1, 'tail2': tail2, 'tail3': tail3}
    return fused, raw


# ---------------------------------- forward ----------------------------------

def puca_forward(params, x, dilation):
    # Eval mode, refine=False -> pd = pd[1] = 1 -> reflect-pad branch.
    B, Cimg, H, W = x.shape
    d = dilation
    p = 2 * d
    K = 2 * d - 1
    c = K // 2

    # intro (1x1) commutes with reflect padding -> pad raw input, fold intro
    # into the masked-conv tap weights.
    xp = jnp.pad(x, ((0, 0), (0, 0), (p, p), (p, p)), mode='reflect')
    Hp, Wp = H + 2 * p, W + 2 * p

    # Homogeneous channel: zero-padded pixels are exactly the 0 the reference
    # masked conv sees on the intro *output*, so the fold stays exact.
    ones = jnp.ones((B, 1, Hp, Wp), x.dtype)
    xa = jnp.concatenate([xp, ones], axis=1)                    # (B, Cimg+1, .)
    mp = d - 1                                                  # conv zero pad
    xz = jnp.pad(xa, ((0, 0), (0, 0), (mp, mp), (mp, mp)))

    taps = []
    for kh in range(K):
        for kw in range(K):
            if kh == c and kw == c:
                continue                                        # central mask
            taps.append(xz[:, :, kh:kh + Hp, kw:kw + Wp])
    im2col = jnp.concatenate(taps, axis=1).reshape(B, -1, Hp * Wp)

    # intro + CentralMaskedConv2d + 1x1 + 1x1 -> one matmul
    enc0 = conv1x1(im2col, *params['fused_mc'])                 # (B, width, Hp*Wp)
    width = enc0.shape[1]

    # encoder stage 0: empty Sequential == identity
    y = conv1x1(enc0, *params['down0'])                         # (B, width//2, .)
    y = downsample(y.reshape(B, -1, Hp, Wp), d)                 # (B, 2w, Hp/d, Wp/d)
    Bc, C2, H2, W2 = y.shape
    # middle_blks: identity
    y = conv1x1(y.reshape(B, C2, H2 * W2), *params['up0'])      # (B, 4w, .)
    y = upsample(y.reshape(B, -1, H2, W2), d)                   # (B, width, Hp, Wp)

    # crop commutes with the remaining pointwise ops -> crop first, then fuse
    # skip-add + final + tail(4 convs) into one kernel.
    y = y[:, :, p:-p, p:-p].reshape(B, width, H * W)
    skip = enc0.reshape(B, width, Hp, Wp)[:, :, p:-p, p:-p].reshape(B, width, H * W)
    out = add_conv1x1(y, skip, *params['fused_tail'])           # (B, Cimg, H*W)
    return out.reshape(B, Cimg, H, W)


# ------------------- plain-JAX unfused reference (self-check) ----------------

def _ref_conv1x1(x, w, b):
    return jnp.einsum('oc,bchw->bohw', w, x) + b[None, :, None, None]


def _reference_forward(raw, x, dilation):
    d = dilation
    p = 2 * d
    K = 2 * d - 1
    c = K // 2
    x = _ref_conv1x1(x, *raw['intro'])
    x = jnp.pad(x, ((0, 0), (0, 0), (p, p), (p, p)), mode='reflect')
    B, C, Hp, Wp = x.shape
    mp = d - 1
    xz = jnp.pad(x, ((0, 0), (0, 0), (mp, mp), (mp, mp)))
    wk, bk = raw['mc0']
    acc = jnp.zeros((B, wk.shape[2], Hp, Wp), jnp.float32) + bk[None, :, None, None]
    for kh in range(K):
        for kw in range(K):
            if kh == c and kw == c:
                continue
            acc = acc + jnp.einsum('oc,bchw->bohw', wk[kh, kw],
                                   xz[:, :, kh:kh + Hp, kw:kw + Wp])
    x = _ref_conv1x1(acc, *raw['mc1'])
    x = _ref_conv1x1(x, *raw['mc2'])
    enc0 = x
    x = _ref_conv1x1(x, *raw['down0'])
    x = downsample(x, d)
    x = _ref_conv1x1(x, *raw['up0'])
    x = upsample(x, d)
    x = x + enc0
    x = _ref_conv1x1(x, *raw['final'])
    x = x[:, :, p:-p, p:-p]
    x = _ref_conv1x1(x, *raw['tail0'])
    x = _ref_conv1x1(x, *raw['tail1'])
    x = _ref_conv1x1(x, *raw['tail2'])
    x = _ref_conv1x1(x, *raw['tail3'])
    return x


if __name__ == "__main__":
    img_channel, width, dilation = 4, 8, 2
    B, H, W = 2, 16, 16
    key = jax.random.PRNGKey(0)
    kx, kp = jax.random.split(key)
    x = jax.random.normal(kx, (B, img_channel, H, W), jnp.float32)
    params, raw = init_params(kp, img_channel, dilation, width)

    fwd = jax.jit(functools.partial(puca_forward, dilation=dilation))
    y = jax.block_until_ready(fwd(params, x))
    assert y.shape == (B, img_channel, H, W), y.shape
    assert bool(jnp.all(jnp.isfinite(y)))

    # self-check the offline weight fusion against an unfused plain-JAX port
    y_ref = jax.jit(functools.partial(_reference_forward, dilation=dilation))(raw, x)
    err = float(jnp.max(jnp.abs(y - y_ref)))
    assert err < 1e-3, f"fused vs reference max abs err {err}"

    print("KERNEL_OK")
</pallas_src>

<mosaic_0001>
module attributes {stable_mosaic.version = 11 : i64} {
  func.func @_wxb_kernel(%arg0: i32, %arg1: i32, %arg2: memref<1x40x576xf32, #tpu.memory_space<vmem>>, %arg3: memref<8x40xf32, #tpu.memory_space<vmem>>, %arg4: memref<8x1xf32, #tpu.memory_space<vmem>>, %arg5: memref<1x8x576xf32, #tpu.memory_space<vmem>>) attributes {dimension_semantics = [#tpu.dimension_semantics<parallel>, #tpu.dimension_semantics<parallel>], iteration_bounds = array<i64: 2, 1>, scalar_prefetch = 0 : i64, scratch_operands = 0 : i64, tpu.core_type = #tpu.core_type<tc>, window_params = [{transform_indices = @transform_0, window_bounds = array<i64: 1, 40, 576>}, {pipeline_mode = #tpu.pipeline_mode<synchronous>, transform_indices = @transform_1, window_bounds = array<i64: 8, 40>}, {pipeline_mode = #tpu.pipeline_mode<synchronous>, transform_indices = @transform_2, window_bounds = array<i64: 8, 1>}, {transform_indices = @transform_3, window_bounds = array<i64: 1, 8, 576>}]} {
    %c0 = arith.constant 0 : index
    %c0_0 = arith.constant 0 : index
    %0 = vector.load %arg3[%c0, %c0_0] : memref<8x40xf32, #tpu.memory_space<vmem>>, vector<8x40xf32>
    %c0_1 = arith.constant 0 : index
    %c0_2 = arith.constant 0 : index
    %c0_3 = arith.constant 0 : index
    %1 = vector.load %arg2[%c0_1, %c0_2, %c0_3] : memref<1x40x576xf32, #tpu.memory_space<vmem>>, vector<1x40x576xf32>
    %2 = vector.shape_cast %1 : vector<1x40x576xf32> to vector<40x576xf32>
    %cst = arith.constant dense<0.000000e+00> : vector<8x576xf32>
    %3 = tpu.matmul %0, %2, %cst {dimension_numbers = #tpu.dot_dimension_numbers<[1], [0], [0], [1], [0, 0, 1, 1], [], []>} : vector<8x40xf32>, vector<40x576xf32>, vector<8x576xf32> -> vector<8x576xf32>
    %c0_4 = arith.constant 0 : index
    %c0_5 = arith.constant 0 : index
    %4 = vector.load %arg4[%c0_4, %c0_5] : memref<8x1xf32, #tpu.memory_space<vmem>>, vector<8x1xf32>
    %5 = vector.broadcast %4 : vector<8x1xf32> to vector<8x576xf32>
    %6 = arith.addf %3, %5 : vector<8x576xf32>
    %c0_6 = arith.constant 0 : index
    %c0_7 = arith.constant 0 : index
    %c0_8 = arith.constant 0 : index
    %7 = vector.load %arg5[%c0_6, %c0_7, %c0_8] : memref<1x8x576xf32, #tpu.memory_space<vmem>>, vector<1x8x576xf32>
    %8 = vector.shape_cast %7 : vector<1x8x576xf32> to vector<8x576xf32>
    %9 = vector.shape_cast %6 : vector<8x576xf32> to vector<1x8x576xf32>
    tpu.vector_store %arg5[%c0_6, %c0_7, %c0_8], %9 {strides = array<i32>} : memref<1x8x576xf32, #tpu.memory_space<vmem>>, vector<1x8x576xf32>,
    return
  }
  func.func @transform_0(%arg0: i32, %arg1: i32) -> (i32, i32, i32) {
    %c0_i32 = arith.constant 0 : i32
    %c0_i32_0 = arith.constant 0 : i32
    return %arg0, %c0_i32, %arg1 : i32, i32, i32
  }
  func.func @transform_1(%arg0: i32, %arg1: i32) -> (i32, i32) {
    %c0_i32 = arith.constant 0 : i32
    %c0_i32_0 = arith.constant 0 : i32
    %c0_i32_1 = arith.constant 0 : i32
    return %c0_i32, %c0_i32_0 : i32, i32
  }
  func.func @transform_2(%arg0: i32, %arg1: i32) -> (i32, i32) {
    %c0_i32 = arith.constant 0 : i32
    %c0_i32_0 = arith.constant 0 : i32
    %c0_i32_1 = arith.constant 0 : i32
    return %c0_i32, %c0_i32_0 : i32, i32
  }
  func.func @transform_3(%arg0: i32, %arg1: i32) -> (i32, i32, i32) {
    %c0_i32 = arith.constant 0 : i32
    %c0_i32_0 = arith.constant 0 : i32
    return %arg0, %c0_i32, %arg1 : i32, i32, i32
  }
}

module attributes {stable_mosaic.version = 11 : i64} {
  func.func @_wxb_kernel(%arg0: i32, %arg1: i32, %arg2: memref<1x8x576xf32, #tpu.memory_space<vmem>>, %arg3: memref<4x8xf32, #tpu.memory_space<vmem>>, %arg4: memref<4x1xf32, #tpu.memory_space<vmem>>, %arg5: memref<1x4x576xf32, #tpu.memory_space<vmem>>) attributes {dimension_semantics = [#tpu.dimension_semantics<parallel>, #tpu.dimension_semantics<parallel>], iteration_bounds = array<i64: 2, 1>, scalar_prefetch = 0 : i64, scratch_operands = 0 : i64, tpu.core_type = #tpu.core_type<tc>, window_params = [{transform_indices = @transform_0, window_bounds = array<i64: 1, 8, 576>}, {pipeline_mode = #tpu.pipeline_mode<synchronous>, transform_indices = @transform_1, window_bounds = array<i64: 4, 8>}, {pipeline_mode = #tpu.pipeline_mode<synchronous>, transform_indices = @transform_2, window_bounds = array<i64: 4, 1>}, {transform_indices = @transform_3, window_bounds = array<i64: 1, 4, 576>}]} {
    %c0 = arith.constant 0 : index
    %c0_0 = arith.constant 0 : index
    %0 = vector.load %arg3[%c0, %c0_0] : memref<4x8xf32, #tpu.memory_space<vmem>>, vector<4x8xf32>
    %c0_1 = arith.constant 0 : index
    %c0_2 = arith.constant 0 : index
    %c0_3 = arith.constant 0 : index
    %1 = vector.load %arg2[%c0_1, %c0_2, %c0_3] : memref<1x8x576xf32, #tpu.memory_space<vmem>>, vector<1x8x576xf32>
    %2 = vector.shape_cast %1 : vector<1x8x576xf32> to vector<8x576xf32>
    %cst = arith.constant dense<0.000000e+00> : vector<4x576xf32>
    %3 = tpu.matmul %0, %2, %cst {dimension_numbers = #tpu.dot_dimension_numbers<[1], [0], [0], [1], [0, 0, 1, 1], [], []>} : vector<4x8xf32>, vector<8x576xf32>, vector<4x576xf32> -> vector<4x576xf32>
    %c0_4 = arith.constant 0 : index
    %c0_5 = arith.constant 0 : index
    %4 = vector.load %arg4[%c0_4, %c0_5] : memref<4x1xf32, #tpu.memory_space<vmem>>, vector<4x1xf32>
    %5 = vector.broadcast %4 : vector<4x1xf32> to vector<4x576xf32>
    %6 = arith.addf %3, %5 : vector<4x576xf32>
    %c0_6 = arith.constant 0 : index
    %c0_7 = arith.constant 0 : index
    %c0_8 = arith.constant 0 : index
    %7 = vector.load %arg5[%c0_6, %c0_7, %c0_8] : memref<1x4x576xf32, #tpu.memory_space<vmem>>, vector<1x4x576xf32>
    %8 = vector.shape_cast %7 : vector<1x4x576xf32> to vector<4x576xf32>
    %9 = vector.shape_cast %6 : vector<4x576xf32> to vector<1x4x576xf32>
    tpu.vector_store %arg5[%c0_6, %c0_7, %c0_8], %9 {strides = array<i32>} : memref<1x4x576xf32, #tpu.memory_space<vmem>>, vector<1x4x576xf32>,
    return
  }
  func.func @transform_0(%arg0: i32, %arg1: i32) -> (i32, i32, i32) {
    %c0_i32 = arith.constant 0 : i32
    %c0_i32_0 = arith.constant 0 : i32
    return %arg0, %c0_i32, %arg1 : i32, i32, i32
  }
  func.func @transform_1(%arg0: i32, %arg1: i32) -> (i32, i32) {
    %c0_i32 = arith.constant 0 : i32
    %c0_i32_0 = arith.constant 0 : i32
    %c0_i32_1 = arith.constant 0 : i32
    return %c0_i32, %c0_i32_0 : i32, i32
  }
  func.func @transform_2(%arg0: i32, %arg1: i32) -> (i32, i32) {
    %c0_i32 = arith.constant 0 : i32
    %c0_i32_0 = arith.constant 0 : i32
    %c0_i32_1 = arith.constant 0 : i32
    return %c0_i32, %c0_i32_0 : i32, i32
  }
  func.func @transform_3(%arg0: i32, %arg1: i32) -> (i32, i32, i32) {
    %c0_i32 = arith.constant 0 : i32
    %c0_i32_0 = arith.constant 0 : i32
    return %arg0, %c0_i32, %arg1 : i32, i32, i32
  }
}

module attributes {stable_mosaic.version = 11 : i64} {
  func.func @_wxb_kernel(%arg0: i32, %arg1: i32, %arg2: memref<1x16x144xf32, #tpu.memory_space<vmem>>, %arg3: memref<32x16xf32, #tpu.memory_space<vmem>>, %arg4: memref<32x1xf32, #tpu.memory_space<vmem>>, %arg5: memref<1x32x144xf32, #tpu.memory_space<vmem>>) attributes {dimension_semantics = [#tpu.dimension_semantics<parallel>, #tpu.dimension_semantics<parallel>], iteration_bounds = array<i64: 2, 1>, scalar_prefetch = 0 : i64, scratch_operands = 0 : i64, tpu.core_type = #tpu.core_type<tc>, window_params = [{transform_indices = @transform_0, window_bounds = array<i64: 1, 16, 144>}, {pipeline_mode = #tpu.pipeline_mode<synchronous>, transform_indices = @transform_1, window_bounds = array<i64: 32, 16>}, {pipeline_mode = #tpu.pipeline_mode<synchronous>, transform_indices = @transform_2, window_bounds = array<i64: 32, 1>}, {transform_indices = @transform_3, window_bounds = array<i64: 1, 32, 144>}]} {
    %c0 = arith.constant 0 : index
    %c0_0 = arith.constant 0 : index
    %0 = vector.load %arg3[%c0, %c0_0] : memref<32x16xf32, #tpu.memory_space<vmem>>, vector<32x16xf32>
    %c0_1 = arith.constant 0 : index
    %c0_2 = arith.constant 0 : index
    %c0_3 = arith.constant 0 : index
    %1 = vector.load %arg2[%c0_1, %c0_2, %c0_3] : memref<1x16x144xf32, #tpu.memory_space<vmem>>, vector<1x16x144xf32>
    %2 = vector.shape_cast %1 : vector<1x16x144xf32> to vector<16x144xf32>
    %cst = arith.constant dense<0.000000e+00> : vector<32x144xf32>
    %3 = tpu.matmul %0, %2, %cst {dimension_numbers = #tpu.dot_dimension_numbers<[1], [0], [0], [1], [0, 0, 1, 1], [], []>} : vector<32x16xf32>, vector<16x144xf32>, vector<32x144xf32> -> vector<32x144xf32>
    %c0_4 = arith.constant 0 : index
    %c0_5 = arith.constant 0 : index
    %4 = vector.load %arg4[%c0_4, %c0_5] : memref<32x1xf32, #tpu.memory_space<vmem>>, vector<32x1xf32>
    %5 = vector.broadcast %4 : vector<32x1xf32> to vector<32x144xf32>
    %6 = arith.addf %3, %5 : vector<32x144xf32>
    %c0_6 = arith.constant 0 : index
    %c0_7 = arith.constant 0 : index
    %c0_8 = arith.constant 0 : index
    %7 = vector.load %arg5[%c0_6, %c0_7, %c0_8] : memref<1x32x144xf32, #tpu.memory_space<vmem>>, vector<1x32x144xf32>
    %8 = vector.shape_cast %7 : vector<1x32x144xf32> to vector<32x144xf32>
    %9 = vector.shape_cast %6 : vector<32x144xf32> to vector<1x32x144xf32>
    tpu.vector_store %arg5[%c0_6, %c0_7, %c0_8], %9 {strides = array<i32>} : memref<1x32x144xf32, #tpu.memory_space<vmem>>, vector<1x32x144xf32>,
    return
  }
  func.func @transform_0(%arg0: i32, %arg1: i32) -> (i32, i32, i32) {
    %c0_i32 = arith.constant 0 : i32
    %c0_i32_0 = arith.constant 0 : i32
    return %arg0, %c0_i32, %arg1 : i32, i32, i32
  }
  func.func @transform_1(%arg0: i32, %arg1: i32) -> (i32, i32) {
    %c0_i32 = arith.constant 0 : i32
    %c0_i32_0 = arith.constant 0 : i32
    %c0_i32_1 = arith.constant 0 : i32
    return %c0_i32, %c0_i32_0 : i32, i32
  }
  func.func @transform_2(%arg0: i32, %arg1: i32) -> (i32, i32) {
    %c0_i32 = arith.constant 0 : i32
    %c0_i32_0 = arith.constant 0 : i32
    %c0_i32_1 = arith.constant 0 : i32
    return %c0_i32, %c0_i32_0 : i32, i32
  }
  func.func @transform_3(%arg0: i32, %arg1: i32) -> (i32, i32, i32) {
    %c0_i32 = arith.constant 0 : i32
    %c0_i32_0 = arith.constant 0 : i32
    return %arg0, %c0_i32, %arg1 : i32, i32, i32
  }
}

module attributes {stable_mosaic.version = 11 : i64} {
  func.func @_add_wxb_kernel(%arg0: i32, %arg1: i32, %arg2: memref<1x8x256xf32, #tpu.memory_space<vmem>>, %arg3: memref<1x8x256xf32, #tpu.memory_space<vmem>>, %arg4: memref<4x8xf32, #tpu.memory_space<vmem>>, %arg5: memref<4x1xf32, #tpu.memory_space<vmem>>, %arg6: memref<1x4x256xf32, #tpu.memory_space<vmem>>) attributes {dimension_semantics = [#tpu.dimension_semantics<parallel>, #tpu.dimension_semantics<parallel>], iteration_bounds = array<i64: 2, 1>, scalar_prefetch = 0 : i64, scratch_operands = 0 : i64, tpu.core_type = #tpu.core_type<tc>, window_params = [{transform_indices = @transform_0, window_bounds = array<i64: 1, 8, 256>}, {transform_indices = @transform_1, window_bounds = array<i64: 1, 8, 256>}, {pipeline_mode = #tpu.pipeline_mode<synchronous>, transform_indices = @transform_2, window_bounds = array<i64: 4, 8>}, {pipeline_mode = #tpu.pipeline_mode<synchronous>, transform_indices = @transform_3, window_bounds = array<i64: 4, 1>}, {transform_indices = @transform_4, window_bounds = array<i64: 1, 4, 256>}]} {
    %c0 = arith.constant 0 : index
    %c0_0 = arith.constant 0 : index
    %0 = vector.load %arg4[%c0, %c0_0] : memref<4x8xf32, #tpu.memory_space<vmem>>, vector<4x8xf32>
    %c0_1 = arith.constant 0 : index
    %c0_2 = arith.constant 0 : index
    %c0_3 = arith.constant 0 : index
    %1 = vector.load %arg2[%c0_1, %c0_2, %c0_3] : memref<1x8x256xf32, #tpu.memory_space<vmem>>, vector<1x8x256xf32>
    %2 = vector.shape_cast %1 : vector<1x8x256xf32> to vector<8x256xf32>
    %c0_4 = arith.constant 0 : index
    %c0_5 = arith.constant 0 : index
    %c0_6 = arith.constant 0 : index
    %3 = vector.load %arg3[%c0_4, %c0_5, %c0_6] : memref<1x8x256xf32, #tpu.memory_space<vmem>>, vector<1x8x256xf32>
    %4 = vector.shape_cast %3 : vector<1x8x256xf32> to vector<8x256xf32>
    %5 = arith.addf %2, %4 : vector<8x256xf32>
    %cst = arith.constant dense<0.000000e+00> : vector<4x256xf32>
    %6 = tpu.matmul %0, %5, %cst {dimension_numbers = #tpu.dot_dimension_numbers<[1], [0], [0], [1], [0, 0, 1, 1], [], []>} : vector<4x8xf32>, vector<8x256xf32>, vector<4x256xf32> -> vector<4x256xf32>
    %c0_7 = arith.constant 0 : index
    %c0_8 = arith.constant 0 : index
    %7 = vector.load %arg5[%c0_7, %c0_8] : memref<4x1xf32, #tpu.memory_space<vmem>>, vector<4x1xf32>
    %8 = vector.broadcast %7 : vector<4x1xf32> to vector<4x256xf32>
    %9 = arith.addf %6, %8 : vector<4x256xf32>
    %c0_9 = arith.constant 0 : index
    %c0_10 = arith.constant 0 : index
    %c0_11 = arith.constant 0 : index
    %10 = vector.load %arg6[%c0_9, %c0_10, %c0_11] : memref<1x4x256xf32, #tpu.memory_space<vmem>>, vector<1x4x256xf32>
    %11 = vector.shape_cast %10 : vector<1x4x256xf32> to vector<4x256xf32>
    %12 = vector.shape_cast %9 : vector<4x256xf32> to vector<1x4x256xf32>
    tpu.vector_store %arg6[%c0_9, %c0_10, %c0_11], %12 {strides = array<i32>} : memref<1x4x256xf32, #tpu.memory_space<vmem>>, vector<1x4x256xf32>,
    return
  }
  func.func @transform_0(%arg0: i32, %arg1: i32) -> (i32, i32, i32) {
    %c0_i32 = arith.constant 0 : i32
    %c0_i32_0 = arith.constant 0 : i32
    return %arg0, %c0_i32, %arg1 : i32, i32, i32
  }
  func.func @transform_1(%arg0: i32, %arg1: i32) -> (i32, i32, i32) {
    %c0_i32 = arith.constant 0 : i32
    %c0_i32_0 = arith.constant 0 : i32
    return %arg0, %c0_i32, %arg1 : i32, i32, i32
  }
  func.func @transform_2(%arg0: i32, %arg1: i32) -> (i32, i32) {
    %c0_i32 = arith.constant 0 : i32
    %c0_i32_0 = arith.constant 0 : i32
    %c0_i32_1 = arith.constant 0 : i32
    return %c0_i32, %c0_i32_0 : i32, i32
  }
  func.func @transform_3(%arg0: i32, %arg1: i32) -> (i32, i32) {
    %c0_i32 = arith.constant 0 : i32
    %c0_i32_0 = arith.constant 0 : i32
    %c0_i32_1 = arith.constant 0 : i32
    return %c0_i32, %c0_i32_0 : i32, i32
  }
  func.func @transform_4(%arg0: i32, %arg1: i32) -> (i32, i32, i32) {
    %c0_i32 = arith.constant 0 : i32
    %c0_i32_0 = arith.constant 0 : i32
    return %arg0, %c0_i32, %arg1 : i32, i32, i32
  }
}

</mosaic_0001>

<bundles_post_ra>
// kernel: puca_forward.5
= control target key start
LH: loop header
LB: loop body
LE: loop exit
PB: predicated region body
PF: predicated region fallthrough
CT: control target
= control target key end

     0   :  { %s633_s12 = smov 0   ;;  %s635_s13 = smov 0   ;;  %s676_s0 = inlined_call_operand.vmem [shape: f32[2,8,576], index: 0, kind: input, shape index: {}]   ;;  %s677_s1 = inlined_call_operand.vmem [shape: f32[4,8], index: 1, kind: input, shape index: {}]   ;;  %s678_s2 = inlined_call_operand.vmem [shape: f32[4,1], index: 2, kind: input, shape index: {}]   ;;  %s679_s3 = inlined_call_operand.vmem [shape: f32[2,4,576], index: 3, kind: output, shape index: {}]  }
   0x1   :  { %s637_s14 = smov 0  }
   0x2 LB: > { %s25_s15 = sadd.s32 1, %s604_s13  ;;  %p541_p0 = scmp.ge.s32.totalorder %s608_s14, 1  ;;  %s608_s14 = sphi %s637_s14, %s13_s14   ;;  %s604_s13 = sphi %s635_s13, %s681_s13   ;;  %s600_s12 = sphi %s633_s12, %s680_s12  }
   0x3   : > { %p27_p1 = scmp.ge.s32.totalorder %s25_s15, 2  ;;  %p158_p2 = scmp.lt.s32.totalorder %s608_s14, 3 }
   0x5   : > { %s683_s15 = smov (%p27_p1, %s25_s15), 0  ;;  %p159_p3 = pnand %p541_p0, %p158_p2 }
   0x6   : > { %p191_p4 = scmp.lt.s32.totalorder (!%p159_p3), %s600_s12, 1 }
   0x7   : > { %162 = sbr.rel (%p159_p3) target bundleno = 220 (0xdc), region = 32 }
   0xc   : > { %v610_v0 = vmov 0.0   ;;  %v216_v1 = vld [vmem:[%s678_s2] sm:$0xf]  ;;  %s685_s12 = smov (!%p191_p4, %s600_s12), 1  ;;  %v611_v2 = vmov 0   ;;  %vm222_vm0 = vcmask 64512  }
   0xd   : > { %290 = vmatprep.mubr.f32.mxu0 %v610_v0  ;;  %361 = vmatprep.mubr.f32.mxu1 %v610_v0  ;;  %s556_s18 = smul.u32 40, %s685_s12  ;;  %v210_v3 = vld [vmem:[%s677_s1] sm:$0xf]  ;;  %vm612_vm1 = vmmov 0   ;;  %vm448_vm2 = vcmask 519168  }
   0xe   : > { %585 = vset.pattern.permute.xlu0 %v611_v2  ;;  %s557_s24 = smul.u32 20, %s685_s12 }
   0xf   : > { %219 = vperm.xlu0 %585, %v216_v1   ;;  %s198_s21 = scalar_lea.vmem %s676_s0, %s556_s18 }
  0x10   : > { %v212_v4 = vld [vmem:[%s198_s21 + $0x8] sm:$0xff]  ;;  %v214_v5 = vld [vmem:[%s198_s21 + $0x18] sm:$0xff]  ;;  %v211_v6 = vld [vmem:[%s198_s21] sm:$0xff]  ;;  %s208_s27 = scalar_lea.vmem %s679_s3, %s557_s24 }
  0x11   : > { %256 = vmatprep.subr.mxu0 %v212_v4  ;;  %327 = vmatprep.subr.mxu1 %v214_v5  ;;  %v213_v7 = vld [vmem:[%s198_s21 + $0x10] sm:$0xff]  ;;  %v215_v8 = vld [vmem:[%s198_s21 + $0x20] sm:$0xff] }
  0x12   : > { %257 = vmatpush1.msra.mxu0 %v211_v6  ;;  %328 = vmatpush1.msra.mxu1 %v213_v7 }
  0x13   : > { %544 = vmatmul.mubr.msk.f32.vlgmr.msra.gmra.mxu0 %vm222_vm0, %v210_v3  ;;  %545 = vmatmul.mubr.msk.f32.vlgmr.msra.gmra.mxu1 %vm222_vm0, %v210_v3 }
  0x14   : > { %551 = vmatprep.subr.mxu0 %v610_v0  ;;  %553 = vmatprep.mubr.msk.f32.mxu0 %vm612_vm1, %v610_v0 }
  0x15   : > { %552 = vmatpush3.msra.mxu0 %v215_v8 }
  0x17   : > { %554 = vmatmul.mubr.msk.f32.vlgmr.msra.gmra.mxu0 %vm222_vm0, %v210_v3 }
  0x8a   : > { %v220_v9 = vpop.permute.xlu0 %219 }
  0xd3   : > { %v292_v10 = vpop.f32.mrf.mxu0  ;;  %v363_v11 = vpop.f32.mrf.mxu1 }
  0xd4   : > { %v293_v14 = vadd.f32 %v292_v10, %v220_v9  ;;  %v364_v16 = vadd.f32 %v363_v11, %v220_v9 }
  0xd5   : > { %v294_v12 = vpop.f32.mrf.mxu0  ;;  %v365_v13 = vpop.f32.mrf.mxu1 }
  0xd6   : > { %v295_v15 = vadd.f32 %v294_v12, %v220_v9  ;;  %v366_v17 = vadd.f32 %v365_v13, %v220_v9 }
  0xd7   : > { %v434_v18 = vpop.f32.mrf.mxu0 }
  0xd8   : > { %v442_v19 = vcombine.low %v293_v14, %v295_v15  ;;  %v443_v20 = vcombine.low %v364_v16, %v366_v17  ;;  %v435_v21 = vadd.f32 %v434_v18, %v220_v9 }
  0xd9   : > { %v555_v22 = vpop.f32.mrf.mxu0 }
  0xda   : > { %446 = vst [vmem:[%s208_s27] sm:$0xff] %v442_v19  ;;  %447 = vst [vmem:[%s208_s27 + $0x8] sm:$0xff] %v443_v20 }
  0xdb   : > { %449 = vst.msk [vmem:[%s208_s27 + $0x10] sm:$0xf] %vm448_vm2, %v435_v21 }
  0xdc PF: > { %s13_s14 = sadd.s32 1, %s608_s14   ;;  %s680_s12 = smov %s604_s13 }
  0xdd   : > { %p10_p5 = scmp.ge.s32.totalorder %s13_s14, 4   ;;  %s681_s13 = smov %s683_s15 }
  0xdf   :  { %12 = sbr.rel (!%p10_p5) target bundleno = 2 (0x2), region = 62 }

// kernel: puca_forward.4
= control target key start
LH: loop header
LB: loop body
LE: loop exit
PB: predicated region body
PF: predicated region fallthrough
CT: control target
= control target key end

     0   :  { %s659_s12 = smov 0   ;;  %s661_s13 = smov 0   ;;  %s740_s0 = inlined_call_operand.vmem [shape: f32[2,40,576], index: 0, kind: input, shape index: {}]   ;;  %s741_s1 = inlined_call_operand.vmem [shape: f32[8,40], index: 1, kind: input, shape index: {}]   ;;  %s742_s2 = inlined_call_operand.vmem [shape: f32[8,1], index: 2, kind: input, shape index: {}]   ;;  %s743_s3 = inlined_call_operand.vmem [shape: f32[2,8,576], index: 3, kind: output, shape index: {}]  }
   0x1   :  { %s663_s14 = smov 0  }
   0x2 LB: > { %s25_s15 = sadd.s32 1, %s630_s13  ;;  %p555_p0 = scmp.ge.s32.totalorder %s634_s14, 1  ;;  %s634_s14 = sphi %s663_s14, %s13_s14   ;;  %s630_s13 = sphi %s661_s13, %s745_s13   ;;  %s626_s12 = sphi %s659_s12, %s744_s12  }
   0x3   : > { %p27_p1 = scmp.ge.s32.totalorder %s25_s15, 2  ;;  %p158_p2 = scmp.lt.s32.totalorder %s634_s14, 3 }
   0x5   : > { %s747_s15 = smov (%p27_p1, %s25_s15), 0  ;;  %p159_p3 = pnand %p555_p0, %p158_p2 }
   0x6   : > { %p191_p4 = scmp.lt.s32.totalorder (!%p159_p3), %s626_s12, 1 }
   0x7   : > { %162 = sbr.rel (%p159_p3) target bundleno = 233 (0xe9), region = 32 }
   0xc   : > { %v636_v0 = vmov 0.0   ;;  %v236_v1 = vld [vmem:[%s742_s2] sm:$0xff]  ;;  %s749_s12 = smov (!%p191_p4, %s626_s12), 1  ;;  %v637_v2 = vmov 0   ;;  %vm242_vm0 = vcmask 326656   ;;  %vm638_vm1 = vmmov 0  }
   0xd   : > { %310 = vmatprep.mubr.f32.mxu0 %v636_v0  ;;  %381 = vmatprep.mubr.f32.mxu1 %v636_v0  ;;  %s582_s18 = smul.u32 200, %s749_s12  ;;  %v210_v21 = vld [vmem:[%s741_s1] sm:$0xff]  ;;  %vm462_vm2 = vcmask 523264  }
   0xe   : > { %611 = vset.pattern.permute.xlu0 %v637_v2  ;;  %s583_s24 = smul.u32 40, %s749_s12 }
   0xf   : > { %239 = vperm.xlu0 %611, %v236_v1   ;;  %s688_s21 = scalar_lea.vmem %s740_s0, %s582_s18 }
  0x10   : > { %v232_v3 = vld [vmem:[%s688_s21 + $0xa8] sm:$0xff]  ;;  %v231_v4 = vld [vmem:[%s688_s21 + $0xa0] sm:$0xff]  ;;  %v226_v6 = vld [vmem:[%s688_s21 + $0x78] sm:$0xff]  ;;  %s208_s27 = scalar_lea.vmem %s743_s3, %s583_s24 }
  0x11   : > { %v227_v5 = vld [vmem:[%s688_s21 + $0x80] sm:$0xff]  ;;  %268 = vmatprep.subr.mxu0 %v232_v3  ;;  %v222_v7 = vld [vmem:[%s688_s21 + $0x58] sm:$0xff]  ;;  %v221_v9 = vld [vmem:[%s688_s21 + $0x50] sm:$0xff] }
  0x12   : > { %269 = vmatpush1.msra.mxu0 %v231_v4  ;;  %v234_v8 = vld [vmem:[%s688_s21 + $0xb8] sm:$0xff]  ;;  %v233_v10 = vld [vmem:[%s688_s21 + $0xb0] sm:$0xff]  ;;  %v228_v13 = vld [vmem:[%s688_s21 + $0x88] sm:$0xff] }
  0x13   : > { %270 = vmatprep.subr.mxu0 %v227_v5  ;;  %339 = vmatprep.subr.mxu1 %v234_v8  ;;  %v229_v11 = vld [vmem:[%s688_s21 + $0x90] sm:$0xff]  ;;  %v224_v14 = vld [vmem:[%s688_s21 + $0x68] sm:$0xff]  ;;  %v223_v16 = vld [vmem:[%s688_s21 + $0x60] sm:$0xff] }
  0x14   : > { %271 = vmatpush1.msra.mxu0 %v226_v6  ;;  %v217_v12 = vld [vmem:[%s688_s21 + $0x30] sm:$0xff]  ;;  %340 = vmatpush1.msra.mxu1 %v233_v10  ;;  %v216_v15 = vld [vmem:[%s688_s21 + $0x28] sm:$0xff]  ;;  %v219_v18 = vld [vmem:[%s688_s21 + $0x40] sm:$0xff] }
  0x15   : > { %272 = vmatprep.subr.mxu0 %v222_v7  ;;  %341 = vmatprep.subr.mxu1 %v229_v11  ;;  %v212_v17 = vld [vmem:[%s688_s21 + $0x8] sm:$0xff]  ;;  %v211_v19 = vld [vmem:[%s688_s21] sm:$0xff]  ;;  %v218_v20 = vld [vmem:[%s688_s21 + $0x38] sm:$0xff] }
  0x16   : > { %273 = vmatpush1.msra.mxu0 %v221_v9  ;;  %342 = vmatpush1.msra.mxu1 %v228_v13  ;;  %v235_v22 = vld [vmem:[%s688_s21 + $0xc0] sm:$0xff]  ;;  %v214_v23 = vld [vmem:[%s688_s21 + $0x18] sm:$0xff]  ;;  %v213_v24 = vld [vmem:[%s688_s21 + $0x10] sm:$0xff] }
  0x17   : > { %274 = vmatprep.subr.mxu0 %v217_v12  ;;  %343 = vmatprep.subr.mxu1 %v224_v14  ;;  %v230_v25 = vld [vmem:[%s688_s21 + $0x98] sm:$0xff]  ;;  %v225_v26 = vld [vmem:[%s688_s21 + $0x70] sm:$0xff]  ;;  %v220_v27 = vld [vmem:[%s688_s21 + $0x48] sm:$0xff] }
  0x18   : > { %275 = vmatpush1.msra.mxu0 %v216_v15  ;;  %344 = vmatpush1.msra.mxu1 %v223_v16  ;;  %v215_v28 = vld [vmem:[%s688_s21 + $0x20] sm:$0xff] }
  0x19   : > { %276 = vmatprep.subr.mxu0 %v212_v17  ;;  %345 = vmatprep.subr.mxu1 %v219_v18 }
  0x1a   : > { %277 = vmatpush1.msra.mxu0 %v211_v19  ;;  %346 = vmatpush1.msra.mxu1 %v218_v20 }
  0x1b   : > { %558 = vmatmul.mubr.msk.f32.vlgmr.msra.gmra.mxu0 %vm242_vm0, %v210_v21  ;;  %569 = vmatprep.subr.mxu0 %v636_v0 }
  0x1c   : > { %570 = vmatpush3.msra.mxu0 %v235_v22  ;;  %347 = vmatprep.subr.mxu1 %v214_v23 }
  0x1d   : > { %571 = vmatprep.subr.mxu0 %v636_v0  ;;  %348 = vmatpush1.msra.mxu1 %v213_v24 }
  0x1e   : > { %572 = vmatpush3.msra.mxu0 %v230_v25  ;;  %559 = vmatmul.mubr.msk.f32.vlgmr.msra.gmra.mxu1 %vm242_vm0, %v210_v21 }
  0x1f   : > { %573 = vmatprep.subr.mxu0 %v636_v0  ;;  %579 = vmatprep.mubr.msk.f32.mxu0 %vm638_vm1, %v636_v0 }
  0x20   : > { %574 = vmatpush3.msra.mxu0 %v225_v26 }
  0x21   : > { %575 = vmatprep.subr.mxu0 %v636_v0 }
  0x22   : > { %576 = vmatpush3.msra.mxu0 %v220_v27 }
  0x23   : > { %577 = vmatprep.subr.mxu0 %v636_v0 }
  0x24   : > { %578 = vmatpush3.msra.mxu0 %v215_v28 }
  0x25   : > { %580 = vmatmul.mubr.msk.f32.vlgmr.msra.gmra.mxu0 %vm242_vm0, %v210_v21 }
  0x8a   : > { %v240_v29 = vpop.permute.xlu0 %239 }
  0xdb   : > { %v312_v30 = vpop.f32.mrf.mxu0 }
  0xdc   : > { %v313_v31 = vadd.f32 %v312_v30, %v240_v29 }
  0xdd   : > { %v314_v32 = vpop.f32.mrf.mxu0 }
  0xde   : > { %458 = vst [vmem:[%s208_s27] sm:$0xff] %v313_v31  ;;  %v315_v33 = vadd.f32 %v314_v32, %v240_v29  ;;  %v383_v34 = vpop.f32.mrf.mxu1 }
  0xdf   : > { %v384_v35 = vadd.f32 %v383_v34, %v240_v29 }
  0xe0   : > { %459 = vst [vmem:[%s208_s27 + $0x8] sm:$0xff] %v315_v33  ;;  %v385_v36 = vpop.f32.mrf.mxu1 }
  0xe1   : > { %460 = vst [vmem:[%s208_s27 + $0x10] sm:$0xff] %v384_v35  ;;  %v386_v37 = vadd.f32 %v385_v36, %v240_v29 }
  0xe3   : > { %461 = vst [vmem:[%s208_s27 + $0x18] sm:$0xff] %v386_v37 }
  0xe5   : > { %v454_v38 = vpop.f32.mrf.mxu0 }
  0xe6   : > { %v455_v39 = vadd.f32 %v454_v38, %v240_v29 }
  0xe7   : > { %v581_v40 = vpop.f32.mrf.mxu0 }
  0xe8   : > { %463 = vst.msk [vmem:[%s208_s27 + $0x20] sm:$0xff] %vm462_vm2, %v455_v39 }
  0xe9 PF: > { %s13_s14 = sadd.s32 1, %s634_s14   ;;  %s744_s12 = smov %s630_s13 }
  0xea   : > { %p10_p5 = scmp.ge.s32.totalorder %s13_s14, 4   ;;  %s745_s13 = smov %s747_s15 }
  0xec   :  { %12 = sbr.rel (!%p10_p5) target bundleno = 2 (0x2), region = 62 }

// kernel: puca_forward.6
= control target key start
LH: loop header
LB: loop body
LE: loop exit
PB: predicated region body
PF: predicated region fallthrough
CT: control target
= control target key end

     0   :  { %s534_s12 = smov 0   ;;  %s536_s13 = smov 0   ;;  %s603_s0 = inlined_call_operand.vmem [shape: f32[2,16,144], index: 0, kind: input, shape index: {}]   ;;  %s604_s1 = inlined_call_operand.vmem [shape: f32[32,16], index: 1, kind: input, shape index: {}]   ;;  %s605_s2 = inlined_call_operand.vmem [shape: f32[32,1], index: 2, kind: input, shape index: {}]   ;;  %s606_s3 = inlined_call_operand.vmem [shape: f32[2,32,144], index: 3, kind: output, shape index: {}]  }
   0x1   :  { %s538_s14 = smov 0  }
   0x2 LB: > { %s25_s15 = sadd.s32 1, %s506_s13  ;;  %p443_p0 = scmp.ge.s32.totalorder %s510_s14, 1  ;;  %s510_s14 = sphi %s538_s14, %s13_s14   ;;  %s506_s13 = sphi %s536_s13, %s608_s13   ;;  %s502_s12 = sphi %s534_s12, %s607_s12  }
   0x3   : > { %p27_p1 = scmp.ge.s32.totalorder %s25_s15, 2  ;;  %p158_p2 = scmp.lt.s32.totalorder %s510_s14, 3 }
   0x5   : > { %s610_s15 = smov (%p27_p1, %s25_s15), 0  ;;  %p159_p3 = pnand %p443_p0, %p158_p2 }
   0x6   : > { %p191_p4 = scmp.lt.s32.totalorder (!%p159_p3), %s502_s12, 1 }
   0x7   : > { %162 = sbr.rel (%p159_p3) target bundleno = 222 (0xde), region = 32 }
   0xc   : > { %v512_v0 = vmov 0.0   ;;  %v220_v1 = vld [vmem:[%s605_s2 + $0x10] sm:$0xff]  ;;  %v218_v2 = vld [vmem:[%s605_s2] sm:$0xff]  ;;  %s612_s12 = smov (!%p191_p4, %s502_s12), 1  ;;  %v513_v3 = vmov 0   ;;  %vm242_vm0 = vcmask 130048  }
   0xd   : > { %319 = vmatprep.mubr.f32.mxu0 %v512_v0  ;;  %331 = vmatprep.mubr.f32.mxu1 %v512_v0  ;;  %s454_s20 = sshll.u32 %s612_s12, 5  ;;  %v210_v8 = vld [vmem:[%s604_s1] sm:$0xff]  ;;  %v212_v9 = vld [vmem:[%s604_s1 + $0x10] sm:$0xff]  ;;  %v221_v10 = vld [vmem:[%s605_s2 + $0x18] sm:$0xff]  ;;  %s455_s9 = sshll.u32 %s612_s12, 6 }
   0xe   : > { %487 = vset.pattern.permute.xlu1 %v513_v3  ;;  %486 = vset.pattern.permute.xlu0 %v513_v3  ;;  %s198_s23 = scalar_lea.vmem %s603_s0, %s454_s20  ;;  %v219_v11 = vld [vmem:[%s605_s2 + $0x8] sm:$0xff]  ;;  %v213_v13 = vld [vmem:[%s604_s1 + $0x18] sm:$0xff]  ;;  %s208_s16 = scalar_lea.vmem %s606_s3, %s455_s9 }
   0xf   : > { %234 = vperm.xlu1 %487, %v220_v1   ;;  %224 = vperm.xlu0 %486, %v218_v2   ;;  %v217_v4 = vld [vmem:[%s198_s23 + $0x18] sm:$0xff]  ;;  %v216_v5 = vld [vmem:[%s198_s23 + $0x10] sm:$0xff]  ;;  %v215_v6 = vld [vmem:[%s198_s23 + $0x8] sm:$0xff] }
  0x10   : > { %283 = vmatprep.subr.mxu0 %v217_v4  ;;  %456 = vmatprep.subr.mxu1 %v217_v4  ;;  %v214_v7 = vld [vmem:[%s198_s23] sm:$0xff]  ;;  %v211_v12 = vld [vmem:[%s604_s1 + $0x8] sm:$0xff] }
  0x11   : > { %284 = vmatpush1.msra.mxu0 %v216_v5  ;;  %458 = vmatpush1.msra.mxu1 %v216_v5 }
  0x12   : > { %285 = vmatprep.subr.mxu0 %v215_v6  ;;  %457 = vmatprep.subr.mxu1 %v215_v6 }
  0x13   : > { %286 = vmatpush1.msra.mxu0 %v214_v7  ;;  %459 = vmatpush1.msra.mxu1 %v214_v7 }
  0x14   : > { %448 = vmatmul.mubr.msk.f32.vlgmr.msra.gmra.mxu0 %vm242_vm0, %v210_v8  ;;  %450 = vmatmul.mubr.msk.f32.vlgmr.msra.gmra.mxu1 %vm242_vm0, %v212_v9 }
  0x15   : > { %325 = vmatprep.mubr.f32.mxu0 %v512_v0  ;;  %337 = vmatprep.mubr.f32.mxu1 %v512_v0 }
  0x16   : > { %239 = vperm.xlu1 %487, %v221_v10   ;;  %229 = vperm.xlu0 %486, %v219_v11  }
  0x18   : > { %449 = vmatmul.mubr.msk.f32.gmra.mxu0 %vm242_vm0, %v211_v12  ;;  %451 = vmatmul.mubr.msk.f32.gmra.mxu1 %vm242_vm0, %v213_v13 }
  0x8a   : > { %v235_v14 = vpop.permute.xlu1 %234  ;;  %v225_v15 = vpop.permute.xlu0 %224 }
  0x91   : > { %v240_v22 = vpop.permute.xlu1 %239  ;;  %v230_v23 = vpop.permute.xlu0 %229 }
  0xd4   : > { %v321_v16 = vpop.f32.mrf.mxu0  ;;  %v333_v17 = vpop.f32.mrf.mxu1 }
  0xd5   : > { %v322_v18 = vadd.f32 %v321_v16, %v225_v15  ;;  %v334_v19 = vadd.f32 %v333_v17, %v235_v14 }
  0xd6   : > { %v323_v20 = vpop.f32.mrf.mxu0  ;;  %v335_v21 = vpop.f32.mrf.mxu1 }
  0xd7   : > { %344 = vst [vmem:[%s208_s16] sm:$0xff] %v322_v18  ;;  %348 = vst [vmem:[%s208_s16 + $0x20] sm:$0xff] %v334_v19  ;;  %v324_v24 = vadd.f32 %v323_v20, %v225_v15  ;;  %v336_v25 = vadd.f32 %v335_v21, %v235_v14 }
  0xd8   : > { %v327_v26 = vpop.f32.mrf.mxu0  ;;  %v339_v27 = vpop.f32.mrf.mxu1 }
  0xd9   : > { %345 = vst.msk [vmem:[%s208_s16 + $0x8] sm:$0xff] %vm242_vm0, %v324_v24  ;;  %349 = vst.msk [vmem:[%s208_s16 + $0x28] sm:$0xff] %vm242_vm0, %v336_v25  ;;  %v328_v28 = vadd.f32 %v327_v26, %v230_v23  ;;  %v340_v29 = vadd.f32 %v339_v27, %v240_v22 }
  0xda   : > { %v329_v30 = vpop.f32.mrf.mxu0  ;;  %v341_v31 = vpop.f32.mrf.mxu1 }
  0xdb   : > { %346 = vst [vmem:[%s208_s16 + $0x10] sm:$0xff] %v328_v28  ;;  %350 = vst [vmem:[%s208_s16 + $0x30] sm:$0xff] %v340_v29  ;;  %v330_v32 = vadd.f32 %v329_v30, %v230_v23  ;;  %v342_v33 = vadd.f32 %v341_v31, %v240_v22 }
  0xdd   : > { %347 = vst.msk [vmem:[%s208_s16 + $0x18] sm:$0xff] %vm242_vm0, %v330_v32  ;;  %351 = vst.msk [vmem:[%s208_s16 + $0x38] sm:$0xff] %vm242_vm0, %v342_v33 }
  0xde PF: > { %s13_s14 = sadd.s32 1, %s510_s14   ;;  %s607_s12 = smov %s506_s13 }
  0xdf   : > { %p10_p5 = scmp.ge.s32.totalorder %s13_s14, 4   ;;  %s608_s13 = smov %s610_s15 }
  0xe1   :  { %12 = sbr.rel (!%p10_p5) target bundleno = 2 (0x2), region = 62 }

// kernel: puca_forward.7
= control target key start
LH: loop header
LB: loop body
LE: loop exit
PB: predicated region body
PF: predicated region fallthrough
CT: control target
= control target key end

     0   :  { %s566_s15 = smov 0   ;;  %s568_s16 = smov 0   ;;  %s608_s0 = inlined_call_operand.vmem [shape: f32[2,8,256], index: 0, kind: input, shape index: {}]   ;;  %s609_s1 = inlined_call_operand.vmem [shape: f32[2,8,256], index: 1, kind: input, shape index: {}]   ;;  %s610_s2 = inlined_call_operand.vmem [shape: f32[4,8], index: 2, kind: input, shape index: {}]   ;;  %s611_s3 = inlined_call_operand.vmem [shape: f32[4,1], index: 3, kind: input, shape index: {}]   ;;  %s612_s4 = inlined_call_operand.vmem [shape: f32[2,4,256], index: 4, kind: output, shape index: {}]  }
   0x1   :  { %s570_s17 = smov 0  }
   0x2 LB: > { %s26_s18 = sadd.s32 1, %s533_s16  ;;  %p475_p0 = scmp.ge.s32.totalorder %s537_s17, 1  ;;  %s537_s17 = sphi %s570_s17, %s14_s17   ;;  %s533_s16 = sphi %s568_s16, %s614_s16   ;;  %s529_s15 = sphi %s566_s15, %s613_s15  }
   0x3   : > { %p28_p1 = scmp.ge.s32.totalorder %s26_s18, 2  ;;  %p200_p2 = scmp.lt.s32.totalorder %s537_s17, 3 }
   0x5   : > { %s616_s18 = smov (%p28_p1, %s26_s18), 0  ;;  %p201_p3 = pnand %p475_p0, %p200_p2 }
   0x6   : > { %p244_p4 = scmp.lt.s32.totalorder (!%p201_p3), %s529_s15, 1 }
   0x7   : > { %204 = sbr.rel (%p201_p3) target bundleno = 221 (0xdd), region = 36 }
   0xc   : > { %v539_v0 = vmov 0.0   ;;  %v540_v1 = vmov 0   ;;  %v280_v2 = vld [vmem:[%s611_s3] sm:$0xf]  ;;  %s618_s15 = smov (!%p244_p4, %s529_s15), 1  ;;  %vm286_vm0 = vcmask 64512  }
   0xd   : > { %354 = vmatprep.mubr.f32.mxu0 %v539_v0  ;;  %514 = vset.pattern.permute.xlu0 %v540_v1  ;;  %s485_s21 = sshll.u32 %s618_s15, 4  ;;  %v273_v9 = vld [vmem:[%s610_s2] sm:$0xf]  ;;  %s487_s30 = sshll.u32 %s618_s15, 3 }
   0xe   : > { %283 = vperm.xlu0 %514, %v280_v2   ;;  %s251_s24 = scalar_lea.vmem %s608_s0, %s485_s21  ;;  %s261_s27 = scalar_lea.vmem %s609_s1, %s485_s21 }
   0xf   : > { %v275_v3 = vld [vmem:[%s251_s24 + $0x8] sm:$0xff]  ;;  %v274_v5 = vld [vmem:[%s251_s24] sm:$0xff]  ;;  %s271_s7 = scalar_lea.vmem %s612_s4, %s487_s30 }
  0x10   : > { %v277_v4 = vld [vmem:[%s261_s27 + $0x8] sm:$0xff]  ;;  %v276_v7 = vld [vmem:[%s261_s27] sm:$0xff] }
  0x11   : > { %v279_v6 = vadd.f32 %v277_v4, %v275_v3  ;;  %v278_v8 = vadd.f32 %v276_v7, %v274_v5 }
  0x13   : > { %320 = vmatprep.subr.mxu0 %v279_v6 }
  0x14   : > { %321 = vmatpush1.msra.mxu0 %v278_v8 }
  0x15   : > { %482 = vmatmul.mubr.msk.f32.vlgmr.msra.gmra.mxu0 %vm286_vm0, %v273_v9 }
  0x89   : > { %v284_v10 = vpop.permute.xlu0 %283 }
  0xd5   : > { %v356_v11 = vpop.f32.mrf.mxu0 }
  0xd6   : > { %v357_v13 = vadd.f32 %v356_v11, %v284_v10 }
  0xd7   : > { %v358_v12 = vpop.f32.mrf.mxu0 }
  0xd8   : > { %v359_v14 = vadd.f32 %v358_v12, %v284_v10 }
  0xda   : > { %v363_v15 = vcombine.low %v357_v13, %v359_v14 }
  0xdc   : > { %365 = vst [vmem:[%s271_s7] sm:$0xff] %v363_v15 }
  0xdd PF: > { %s14_s17 = sadd.s32 1, %s537_s17   ;;  %s613_s15 = smov %s533_s16 }
  0xde   : > { %p11_p5 = scmp.ge.s32.totalorder %s14_s17, 4   ;;  %s614_s16 = smov %s616_s18 }
  0xe0   :  { %13 = sbr.rel (!%p11_p5) target bundleno = 2 (0x2), region = 69 }

</bundles_post_ra>
